<compile_context>
chip_gen: v6e
topology: v6e:2x2x1
jax: 0.10.0
libtpu: 0.0.40
codegen_flags: <defaults>
</compile_context>

<pallas_src>
import jax
import jax.numpy as jnp
from jax.experimental import pallas as pl
from jax.experimental.pallas import tpu as pltpu


def _nonlocal_kernel(x_ref, w_proj_ref, w_mask_ref, out_ref):
    # x_ref:      (BT, 2C, S2)  pre-stacked input tile (left half rows 0:C,
    #                           right half rows C:2C)
    # w_proj_ref: (3C, 2C)      rows [phi_s ; g_s ; theta_s], each block-diag
    # w_mask_ref: (2C, C)       block_diag(W_mask, W_mask)
    # out_ref:    (BT, 2C, S2)  output in stacked layout
    bt, c2, s2 = x_ref.shape
    c = c2 // 2
    f32 = jnp.float32

    x = x_ref[...]                                        # (BT, 2C, S2)
    w_proj = w_proj_ref[...]                              # (3C, 2C)
    w_mask = w_mask_ref[...]                              # (2C, C)

    # Fused phi/g/theta projections for the whole batch tile: one batched
    # matmul (tiny weight broadcast along the batch dim).
    w_proj_b = jnp.broadcast_to(w_proj[None], (bt, 3 * c, c2))
    proj = jnp.einsum("boc,bcs->bos", w_proj_b, x,
                      preferred_element_type=f32)         # (BT, 3C, S2)

    phi = proj[:, :c, :]                                  # (BT, C, S2)
    g = proj[:, c:2 * c, :]                               # (BT, C, S2)
    theta = proj[:, 2 * c:, :]                            # (BT, C, S2)

    # Deferred softmax over ALL IC*S elements per batch row (matches
    # softmax(dim=1) on the flattened tensor).  One combined lane-reduce pass
    # over the adjacent phi/g slabs, tiny sublane reduces for the per-slab
    # max/sum, then a single exp pass per slab.
    row_max = jnp.max(proj[:, :2 * c, :], axis=2, keepdims=True)   # (BT, 2C, 1)
    phi_max = jnp.max(row_max[:, :c, :], axis=1, keepdims=True)    # (BT, 1, 1)
    g_max = jnp.max(row_max[:, c:, :], axis=1, keepdims=True)      # (BT, 1, 1)

    e_phi = jnp.exp(phi - phi_max)                        # (BT, C, S2)
    e_g = jnp.exp(g - g_max)                              # (BT, C, S2)
    z_phi = jnp.sum(jnp.sum(e_phi, axis=2, keepdims=True),
                    axis=1, keepdims=True)                # (BT, 1, 1)
    z_g = jnp.sum(jnp.sum(e_g, axis=2, keepdims=True),
                  axis=1, keepdims=True)                  # (BT, 1, 1)

    # Y = softmax(g) @ softmax(phi)^T with the scalar 1/(Z_g*Z_phi) folded
    # into the small (C, C) matrix (exact divide).
    y = jnp.einsum("bcs,bds->bcd", e_g, e_phi,
                   preferred_element_type=f32)            # (BT, C, C)
    y = y * (1.0 / (z_g * z_phi))

    z = jnp.einsum("bcd,bds->bcs", y, theta,
                   preferred_element_type=f32)            # (BT, C, S2)

    # conv_mask in stacked layout: one batched matmul + fully dense store.
    w_mask_b = jnp.broadcast_to(w_mask[None], (bt, c2, c))
    out = jnp.einsum("boc,bcs->bos", w_mask_b, z,
                     preferred_element_type=f32)          # (BT, 2C, S2)
    out_ref[...] = out.astype(out_ref.dtype)


def _block_diag2(wt):
    """(O, I) -> (2O, 2I) block-diagonal stack diag(wt, wt)."""
    zeros = jnp.zeros_like(wt)
    return jnp.block([[wt, zeros], [zeros, wt]])


def nonlocal_block(x, w_phi, w_theta, w_g, w_mask, *, batch_tile=None):
    """x: (B, C, H, W) float32 (NCHW, matching the PyTorch module)."""
    b, c, h, w = x.shape
    ic = c // 2
    s = h * w
    assert c % 2 == 0, "channel must be even"
    assert s % 2 == 0, "h*w must be even (required by the PyTorch view)"
    s2 = s // 2
    del ic  # (only used implicitly via the block-diagonal weights)

    # ---- layout plumbing (wrapper-side; no in-kernel relayouts) -----------
    # Pre-apply the `.view(b, c, -1)` half split to x:
    #   x_st[b, half*C + ch, s] = x[b, ch, half*S2 + s]
    x_st = x.reshape(b, c, 2, s2).transpose(0, 2, 1, 3).reshape(b, 2 * c, s2)

    # Block-diagonal weights so the stacked projection / mask are plain
    # matmuls on the stacked layout.  Row order: [phi ; g ; theta].
    w_proj = jnp.concatenate(
        [_block_diag2(w_phi), _block_diag2(w_g), _block_diag2(w_theta)],
        axis=0)                                           # (3C, 2C)
    w_mask_st = _block_diag2(w_mask)                      # (2C, C)

    # ---- batch tiling ------------------------------------------------------
    if batch_tile is None:
        # Default: one grid step (v5e/v6e are single-TC, and per-step compute
        # here is << per-step overhead, so one step is right on v7x too).
        # Clamp by a conservative VMEM budget (double-buffered in+out blocks)
        # so production sizes stay safe on v7x's 64 MiB VMEM, and always pick
        # a divisor of b.
        budget_bytes = 8 * 1024 * 1024          # per block (x or out)
        per_elem_bytes = 2 * c * s2 * 4
        batch_tile = b
        while batch_tile > 1 and (batch_tile * per_elem_bytes > budget_bytes
                                  or b % batch_tile != 0):
            batch_tile -= 1
    assert b % batch_tile == 0, "batch must be divisible by batch_tile"

    out_st = pl.pallas_call(
        _nonlocal_kernel,
        out_shape=jax.ShapeDtypeStruct((b, 2 * c, s2), jnp.float32),
        grid_spec=pltpu.PrefetchScalarGridSpec(
            num_scalar_prefetch=0,
            grid=(b // batch_tile,),
            in_specs=[
                pl.BlockSpec((batch_tile, 2 * c, s2), lambda i: (i, 0, 0)),
                pl.BlockSpec((3 * c, 2 * c), lambda i: (0, 0)),
                pl.BlockSpec((2 * c, c), lambda i: (0, 0)),
            ],
            out_specs=pl.BlockSpec((batch_tile, 2 * c, s2),
                                   lambda i: (i, 0, 0)),
        ),
        compiler_params=pltpu.CompilerParams(
            dimension_semantics=("parallel",)),
    )(x_st, w_proj, w_mask_st)

    # Undo the stacked layout: out[:, :, :S2] = out_st[:, :C, :],
    #                          out[:, :, S2:] = out_st[:, C:, :].
    out = out_st.reshape(b, 2, c, s2).transpose(0, 2, 1, 3).reshape(b, c, s)
    return out.reshape(b, c, h, w)


def nonlocal_block_reference(x, w_phi, w_theta, w_g, w_mask):
    """Pure-JAX mirror of the PyTorch forward (for verification)."""
    b, c, h, w = x.shape
    ic = c // 2
    xf = x.reshape(b, c, h * w)
    x_phi = jnp.einsum("oc,bcs->bos", w_phi, xf).reshape(b, c, -1)
    x_theta = jnp.einsum("oc,bcs->bos", w_theta, xf).reshape(b, c, -1)
    x_g = jnp.einsum("oc,bcs->bos", w_g, xf).reshape(b, c, -1)
    x_phi1 = jax.nn.softmax(x_phi.reshape(b, -1), axis=1).reshape(b, c, -1)
    x_g1 = jax.nn.softmax(x_g.reshape(b, -1), axis=1).reshape(b, c, -1)
    y = jnp.einsum("bcs,bds->bcd", x_g1, x_phi1)
    y = jnp.einsum("bcd,bds->bcs", y, x_theta)
    f_s = y.reshape(b, ic, h, w)
    return jnp.einsum("oc,bchw->bohw", w_mask, f_s)


if __name__ == "__main__":
    key = jax.random.PRNGKey(0)
    k_x, k_phi, k_theta, k_g, k_mask = jax.random.split(key, 5)

    B, C, H, W = 2, 4, 16, 16
    IC = C // 2

    x = jax.random.normal(k_x, (B, C, H, W), dtype=jnp.float32)
    # Deterministic synthetic weights (kaiming-ish scale), no checkpoint load.
    w_phi = jax.random.normal(k_phi, (IC, C), dtype=jnp.float32) * (1.0 / C) ** 0.5
    w_theta = jax.random.normal(k_theta, (IC, C), dtype=jnp.float32) * (1.0 / C) ** 0.5
    w_g = jax.random.normal(k_g, (IC, C), dtype=jnp.float32) * (1.0 / C) ** 0.5
    w_mask = jax.random.normal(k_mask, (C, IC), dtype=jnp.float32) * (1.0 / IC) ** 0.5

    out = nonlocal_block(x, w_phi, w_theta, w_g, w_mask)
    out = jax.block_until_ready(out)

    ref = nonlocal_block_reference(x, w_phi, w_theta, w_g, w_mask)
    assert out.shape == (B, C, H, W)
    assert jnp.allclose(out, ref, rtol=1e-5, atol=1e-5), "mismatch vs reference"

    print("KERNEL_OK")
</pallas_src>

<mosaic_0001>
module attributes {stable_mosaic.version = 11 : i64} {
  func.func @_nonlocal_kernel(%arg0: i32, %arg1: memref<2x8x128xf32, #tpu.memory_space<vmem>>, %arg2: memref<12x8xf32, #tpu.memory_space<vmem>>, %arg3: memref<8x4xf32, #tpu.memory_space<vmem>>, %arg4: memref<2x8x128xf32, #tpu.memory_space<vmem>>) attributes {dimension_semantics = [#tpu.dimension_semantics<parallel>], iteration_bounds = array<i64: 1>, scalar_prefetch = 0 : i64, scratch_operands = 0 : i64, tpu.core_type = #tpu.core_type<tc>, window_params = [{transform_indices = @transform_0, window_bounds = array<i64: 2, 8, 128>}, {pipeline_mode = #tpu.pipeline_mode<synchronous>, transform_indices = @transform_1, window_bounds = array<i64: 12, 8>}, {pipeline_mode = #tpu.pipeline_mode<synchronous>, transform_indices = @transform_2, window_bounds = array<i64: 8, 4>}, {transform_indices = @transform_3, window_bounds = array<i64: 2, 8, 128>}]} {
    %c0 = arith.constant 0 : index
    %c0_0 = arith.constant 0 : index
    %c0_1 = arith.constant 0 : index
    %0 = vector.load %arg1[%c0, %c0_0, %c0_1] : memref<2x8x128xf32, #tpu.memory_space<vmem>>, vector<2x8x128xf32>
    %c0_2 = arith.constant 0 : index
    %c0_3 = arith.constant 0 : index
    %1 = vector.load %arg2[%c0_2, %c0_3] : memref<12x8xf32, #tpu.memory_space<vmem>>, vector<12x8xf32>
    %c0_4 = arith.constant 0 : index
    %c0_5 = arith.constant 0 : index
    %2 = vector.load %arg3[%c0_4, %c0_5] : memref<8x4xf32, #tpu.memory_space<vmem>>, vector<8x4xf32>
    %3 = vector.shape_cast %1 : vector<12x8xf32> to vector<1x12x8xf32>
    %4 = vector.shape_cast %3 : vector<1x12x8xf32> to vector<1x12x8xf32>
    %5 = vector.broadcast %4 : vector<1x12x8xf32> to vector<2x12x8xf32>
    "tpu.trace_start"() <{level = 10 : i32, message = "boc,bcs->bos"}> : () -> ()
    %cst = arith.constant dense<0.000000e+00> : vector<2x12x128xf32>
    %6 = tpu.matmul %5, %0, %cst {dimension_numbers = #tpu.dot_dimension_numbers<[2], [1], [1], [2], [0, 0, 0, 1, 1, 2], [0], [0]>} : vector<2x12x8xf32>, vector<2x8x128xf32>, vector<2x12x128xf32> -> vector<2x12x128xf32>
    "tpu.trace_stop"() : () -> ()
    %7 = vector.extract_strided_slice %6 {offsets = [0, 0, 0], sizes = [2, 4, 128], strides = [1, 1, 1]} : vector<2x12x128xf32> to vector<2x4x128xf32>
    %8 = vector.extract_strided_slice %6 {offsets = [0, 4, 0], sizes = [2, 4, 128], strides = [1, 1, 1]} : vector<2x12x128xf32> to vector<2x4x128xf32>
    %9 = vector.extract_strided_slice %6 {offsets = [0, 8, 0], sizes = [2, 4, 128], strides = [1, 1, 1]} : vector<2x12x128xf32> to vector<2x4x128xf32>
    %10 = vector.extract_strided_slice %6 {offsets = [0, 0, 0], sizes = [2, 8, 128], strides = [1, 1, 1]} : vector<2x12x128xf32> to vector<2x8x128xf32>
    %cst_6 = arith.constant dense<0xFF800000> : vector<2x8xf32>
    %11 = vector.multi_reduction <maximumf>, %10, %cst_6 [2] : vector<2x8x128xf32> to vector<2x8xf32>
    %12 = vector.shape_cast %11 : vector<2x8xf32> to vector<2x8x1xf32>
    %13 = vector.extract_strided_slice %12 {offsets = [0, 0, 0], sizes = [2, 4, 1], strides = [1, 1, 1]} : vector<2x8x1xf32> to vector<2x4x1xf32>
    %cst_7 = arith.constant dense<0xFF800000> : vector<2x1xf32>
    %14 = vector.multi_reduction <maximumf>, %13, %cst_7 [1] : vector<2x4x1xf32> to vector<2x1xf32>
    %15 = vector.shape_cast %14 : vector<2x1xf32> to vector<2x1x1xf32>
    %16 = vector.extract_strided_slice %12 {offsets = [0, 4, 0], sizes = [2, 4, 1], strides = [1, 1, 1]} : vector<2x8x1xf32> to vector<2x4x1xf32>
    %cst_8 = arith.constant dense<0xFF800000> : vector<2x1xf32>
    %17 = vector.multi_reduction <maximumf>, %16, %cst_8 [1] : vector<2x4x1xf32> to vector<2x1xf32>
    %18 = vector.shape_cast %17 : vector<2x1xf32> to vector<2x1x1xf32>
    %19 = vector.broadcast %15 : vector<2x1x1xf32> to vector<2x4x128xf32>
    %20 = arith.subf %7, %19 : vector<2x4x128xf32>
    %21 = math.exp %20 : vector<2x4x128xf32>
    %22 = vector.broadcast %18 : vector<2x1x1xf32> to vector<2x4x128xf32>
    %23 = arith.subf %8, %22 : vector<2x4x128xf32>
    %24 = math.exp %23 : vector<2x4x128xf32>
    %cst_9 = arith.constant dense<0.000000e+00> : vector<2x4xf32>
    %25 = vector.multi_reduction <add>, %21, %cst_9 [2] : vector<2x4x128xf32> to vector<2x4xf32>
    %26 = vector.shape_cast %25 : vector<2x4xf32> to vector<2x4x1xf32>
    %cst_10 = arith.constant dense<0.000000e+00> : vector<2x1xf32>
    %27 = vector.multi_reduction <add>, %26, %cst_10 [1] : vector<2x4x1xf32> to vector<2x1xf32>
    %28 = vector.shape_cast %27 : vector<2x1xf32> to vector<2x1x1xf32>
    %cst_11 = arith.constant dense<0.000000e+00> : vector<2x4xf32>
    %29 = vector.multi_reduction <add>, %24, %cst_11 [2] : vector<2x4x128xf32> to vector<2x4xf32>
    %30 = vector.shape_cast %29 : vector<2x4xf32> to vector<2x4x1xf32>
    %cst_12 = arith.constant dense<0.000000e+00> : vector<2x1xf32>
    %31 = vector.multi_reduction <add>, %30, %cst_12 [1] : vector<2x4x1xf32> to vector<2x1xf32>
    %32 = vector.shape_cast %31 : vector<2x1xf32> to vector<2x1x1xf32>
    "tpu.trace_start"() <{level = 10 : i32, message = "bcs,bds->bcd"}> : () -> ()
    %cst_13 = arith.constant dense<0.000000e+00> : vector<2x4x4xf32>
    %33 = tpu.matmul %24, %21, %cst_13 {dimension_numbers = #tpu.dot_dimension_numbers<[2], [2], [1], [1], [0, 0, 0, 1, 1, 1], [0], [0]>} : vector<2x4x128xf32>, vector<2x4x128xf32>, vector<2x4x4xf32> -> vector<2x4x4xf32>
    "tpu.trace_stop"() : () -> ()
    %34 = arith.mulf %32, %28 : vector<2x1x1xf32>
    %cst_14 = arith.constant 1.000000e+00 : f32
    %35 = vector.broadcast %cst_14 : f32 to vector<2x1x1xf32>
    %36 = arith.divf %35, %34 : vector<2x1x1xf32>
    %37 = vector.broadcast %36 : vector<2x1x1xf32> to vector<2x4x4xf32>
    %38 = arith.mulf %33, %37 : vector<2x4x4xf32>
    "tpu.trace_start"() <{level = 10 : i32, message = "bcd,bds->bcs"}> : () -> ()
    %cst_15 = arith.constant dense<0.000000e+00> : vector<2x4x128xf32>
    %39 = tpu.matmul %38, %9, %cst_15 {dimension_numbers = #tpu.dot_dimension_numbers<[2], [1], [1], [2], [0, 0, 0, 1, 1, 2], [0], [0]>} : vector<2x4x4xf32>, vector<2x4x128xf32>, vector<2x4x128xf32> -> vector<2x4x128xf32>
    "tpu.trace_stop"() : () -> ()
    %40 = vector.shape_cast %2 : vector<8x4xf32> to vector<1x8x4xf32>
    %41 = vector.shape_cast %40 : vector<1x8x4xf32> to vector<1x8x4xf32>
    %42 = vector.broadcast %41 : vector<1x8x4xf32> to vector<2x8x4xf32>
    "tpu.trace_start"() <{level = 10 : i32, message = "boc,bcs->bos"}> : () -> ()
    %cst_16 = arith.constant dense<0.000000e+00> : vector<2x8x128xf32>
    %43 = tpu.matmul %42, %39, %cst_16 {dimension_numbers = #tpu.dot_dimension_numbers<[2], [1], [1], [2], [0, 0, 0, 1, 1, 2], [0], [0]>} : vector<2x8x4xf32>, vector<2x4x128xf32>, vector<2x8x128xf32> -> vector<2x8x128xf32>
    "tpu.trace_stop"() : () -> ()
    %c0_17 = arith.constant 0 : index
    %c0_18 = arith.constant 0 : index
    %c0_19 = arith.constant 0 : index
    %44 = vector.load %arg4[%c0_17, %c0_18, %c0_19] : memref<2x8x128xf32, #tpu.memory_space<vmem>>, vector<2x8x128xf32>
    tpu.vector_store %arg4[%c0_17, %c0_18, %c0_19], %43 {strides = array<i32>} : memref<2x8x128xf32, #tpu.memory_space<vmem>>, vector<2x8x128xf32>,
    return
  }
  func.func @transform_0(%arg0: i32) -> (i32, i32, i32) {
    %c0_i32 = arith.constant 0 : i32
    %c0_i32_0 = arith.constant 0 : i32
    %c0_i32_1 = arith.constant 0 : i32
    return %arg0, %c0_i32, %c0_i32_0 : i32, i32, i32
  }
  func.func @transform_1(%arg0: i32) -> (i32, i32) {
    %c0_i32 = arith.constant 0 : i32
    %c0_i32_0 = arith.constant 0 : i32
    %c0_i32_1 = arith.constant 0 : i32
    return %c0_i32, %c0_i32_0 : i32, i32
  }
  func.func @transform_2(%arg0: i32) -> (i32, i32) {
    %c0_i32 = arith.constant 0 : i32
    %c0_i32_0 = arith.constant 0 : i32
    %c0_i32_1 = arith.constant 0 : i32
    return %c0_i32, %c0_i32_0 : i32, i32
  }
  func.func @transform_3(%arg0: i32) -> (i32, i32, i32) {
    %c0_i32 = arith.constant 0 : i32
    %c0_i32_0 = arith.constant 0 : i32
    %c0_i32_1 = arith.constant 0 : i32
    return %arg0, %c0_i32, %c0_i32_0 : i32, i32, i32
  }
}

</mosaic_0001>

<bundles_post_ra>
// kernel: tpu_custom_call.1
= control target key start
LH: loop header
LB: loop body
LE: loop exit
PB: predicated region body
PF: predicated region fallthrough
CT: control target
= control target key end

     0   :  { %vm20_vm0 = vcmask 64512   ;;  %s939_s0 = inlined_call_operand.vmem [shape: f32[2,8,128], index: 0, kind: input, shape index: {}]   ;;  %s940_s1 = inlined_call_operand.vmem [shape: f32[12,8], index: 1, kind: input, shape index: {}]   ;;  %s941_s2 = inlined_call_operand.vmem [shape: f32[8,4], index: 2, kind: input, shape index: {}]   ;;  %s942_s3 = inlined_call_operand.hbm [shape: f32[2,8,128], index: 3, kind: output, shape index: {}]  }
   0x1   :  { %v15_v0 = vld [vmem:[%s939_s0] sm:$0xff]  ;;  %v18_v2 = vld [vmem:[%s940_s1 + $0x8] sm:$0xf] }
   0x2   :  { %v17_v1 = vld [vmem:[%s940_s1] sm:$0xff]  ;;  %773 = vmatprep.subr.mxu0 %v15_v0  ;;  %v16_v3 = vld [vmem:[%s939_s0 + $0x8] sm:$0xff] }
   0x3   :  { %775 = vmatprep.mubr.msk.f32.mxu0 %vm20_vm0, %v17_v1 }
   0x4   :  { %8 = vsyncpa [#allocation3], 0  ;;  %774 = vmatpush3.msra.mxu0 %v15_v0  ;;  %778 = vmatprep.subr.mxu1 %v16_v3  ;;  %v852_v8 = vmov 0.0   ;;  %vm853_vm1 = vmmov 0   ;;  %vm181_vm2 = vcmask 1043456   ;;  %vm196_vm3 = vcmask 1047556  }
   0x5   :  { %776 = vmatmul.mubr.msk.f32.vlgmr.msra.gmra.mxu0 %vm20_vm0, %v18_v2  ;;  %779 = vmatpush3.msra.mxu1 %v16_v3  ;;  %vm423_vm4 = vcmask 31744   ;;  %s854_s20 = smov [#allocation2]  }
   0x6   :  { %780 = vmatprep.mubr.msk.f32.mxu1 %vm20_vm0, %v17_v1  ;;  %783 = vmatprep.subr.mxu0 %v852_v8  ;;  %s732_s21 = sshll.u32 %s854_s20, 4  ;;  %s733_s21 = int_to_ptr.vmem [resolvable:$true] %s732_s21 }
   0x7   :  { %781 = vmatmul.mubr.msk.f32.vlgmr.msra.gmra.mxu1 %vm20_vm0, %v18_v2  ;;  %788 = vmatprep.subr.mxu1 %v852_v8  ;;  %p835_p1 = scmp.lt.s32.totalorder %s733_s21, %s733_s21 }
   0x8   :  { %785 = vmatprep.mubr.msk.f32.mxu0 %vm853_vm1, %v852_v8  ;;  %790 = vmatprep.mubr.msk.f32.mxu1 %vm853_vm1, %v852_v8 }
  0xc5   :  { %v889_v4 = vpop.f32.mrf.mxu0 }
  0xc7   :  { %v93_v5 = vpop.f32.mrf.mxu0  ;;  %v891_v6 = vpop.f32.mrf.mxu1 }
  0xc8   :  { %177 = vmax.xlane.f32.xlu0 %v93_v5 }
  0xc9   :  { %v168_v7 = vpop.f32.mrf.mxu1 }
  0xcc   :  { %179 = vmax.xlane.f32.xlu0 %v168_v7 }
 0x151   :  { %v178_v9 = vpop.xlane.xlu0 %177 }
 0x152   :  { %v182_v10 = vsel %vm181_vm2, %v178_v9, -inf  ;;  %v197_v11 = vsel %vm196_vm3, %v178_v9, -inf }
 0x153   :  { %v183_v12 = vrot.slane %v182_v10, 4  ;;  %v198_v13 = vrot.slane %v197_v11, 4 }
 0x155   :  { %v184_v14 = vmax.f32 %v182_v10, %v183_v12  ;;  %v199_v15 = vmax.f32 %v197_v11, %v198_v13  ;;  %v180_v16 = vpop.xlane.xlu0 %179 }
 0x156   :  { %v189_v17 = vsel %vm181_vm2, %v180_v16, -inf  ;;  %v204_v18 = vsel %vm196_vm3, %v180_v16, -inf }
 0x157   :  { %v185_v19 = vrot.slane %v184_v14, 2  ;;  %v200_v20 = vrot.slane %v199_v15, 2  ;;  %v190_v21 = vrot.slane %v189_v17, 4  ;;  %v205_v22 = vrot.slane %v204_v18, 4 }
 0x159   :  { %v186_v23 = vmax.f32 %v184_v14, %v185_v19  ;;  %v201_v24 = vmax.f32 %v199_v15, %v200_v20  ;;  %v191_v25 = vmax.f32 %v189_v17, %v190_v21  ;;  %v206_v26 = vmax.f32 %v204_v18, %v205_v22 }
 0x15b   :  { %v187_v27 = vrot.slane %v186_v23, 1  ;;  %v202_v28 = vrot.slane %v201_v24, 1  ;;  %v192_v29 = vrot.slane %v191_v25, 2  ;;  %v207_v30 = vrot.slane %v206_v26, 2 }
 0x15d   :  { %v188_v31 = vmax.f32 %v186_v23, %v187_v27  ;;  %v203_v32 = vmax.f32 %v201_v24, %v202_v28  ;;  %v193_v33 = vmax.f32 %v191_v25, %v192_v29  ;;  %v208_v34 = vmax.f32 %v206_v26, %v207_v30 }
 0x15f   :  { %v211_v35 = vsub.f32 %v93_v5, %v188_v31  ;;  %v217_v36 = vsub.f32 %v93_v5, %v203_v32  ;;  %v194_v37 = vrot.slane %v193_v33, 1  ;;  %v209_v38 = vrot.slane %v208_v34, 1 }
 0x161   :  { %v213_v39 = vmul.f32 1.442695, %v211_v35  ;;  %v219_v40 = vmul.f32 1.442695, %v217_v36  ;;  %v195_v41 = vmax.f32 %v193_v33, %v194_v37  ;;  %v210_v42 = vmax.f32 %v208_v34, %v209_v38  ;;  %v19_v38 = vld [vmem:[%s941_s2] sm:$0xff]  ;;  %s830_s2 = scalar_lea.vmem %s733_s21, 256 }
 0x162   :  { %p831_p0 = scmp.ne.s32.totalorder %s733_s21, %s830_s2  ;;  %p836_p2 = scmp.lt.s32.totalorder %s830_s2, %s830_s2 }
 0x163   :  { %818 = vpow2.f32 %v213_v39  ;;  %v212_v43 = vsub.f32 %v168_v7, %v195_v41  ;;  %v218_v44 = vsub.f32 %v168_v7, %v210_v42 }
 0x164   :  { %820 = vpow2.f32 %v219_v40  ;;  %p837_p3 = por %p836_p2, %p835_p1 }
 0x165   :  { %v215_v45 = vmul.f32 1.442695, %v212_v43  ;;  %v221_v46 = vmul.f32 1.442695, %v218_v44 }
 0x166   :  { %p838_p4 = pnand %p837_p3, %p831_p0 }
 0x167   :  { %822 = vpow2.f32 %v215_v45 }
 0x168   :  { %824 = vpow2.f32 %v221_v46 }
 0x170   :  { %v819_v47 = vpop.eup %818 }
 0x171   :  { %v821_v48 = vpop.eup %820  ;;  %784 = vmatpush3.xpose.msra.mxu0 %v819_v47  ;;  %v223_v49 = vsel %vm181_vm2, %v819_v47, 0.0 }
 0x172   :  { %v243_v50 = vsel %vm196_vm3, %v821_v48, 0.0  ;;  %224 = vadd.xlane.f32.xlu0 %v223_v49  ;;  %v270_v51 = vrot.slane %v821_v48, 4  ;;  %793 = vmatprep.subr.mxu0 %v852_v8 }
 0x173   :  { %244 = vadd.xlane.f32.xlu1 %v243_v50 }
 0x174   :  { %v823_v52 = vpop.eup %822  ;;  %786 = vmatmul.mubr.f32.vlgmr.msra.gmra.mxu0 %v270_v51 }
 0x175   :  { %v825_v53 = vpop.eup %824  ;;  %789 = vmatpush3.xpose.msra.mxu1 %v823_v52  ;;  %794 = vmatpush3.msk.msra.mxu0 %vm181_vm2, %v889_v4  ;;  %v226_v56 = vsel %vm181_vm2, %v823_v52, 0.0 }
 0x176   :  { %v246_v54 = vsel %vm196_vm3, %v825_v53, 0.0  ;;  %v343_v55 = vrot.slane %v825_v53, 4  ;;  %798 = vmatprep.subr.mxu1 %v852_v8  ;;  %795 = vmatprep.mubr.msk.f32.mxu0 %vm853_vm1, %v852_v8 }
 0x177   :  { %247 = vadd.xlane.f32.xlu1 %v246_v54  ;;  %803 = vmatprep.subr.mxu0 %v852_v8 }
 0x178   :  { %791 = vmatmul.mubr.f32.vlgmr.msra.gmra.mxu1 %v343_v55 }
 0x179   :  { %799 = vmatpush3.msk.msra.mxu1 %vm181_vm2, %v891_v6  ;;  %800 = vmatprep.mubr.msk.f32.mxu1 %vm853_vm1, %v852_v8 }
 0x17a   :  { %808 = vmatprep.subr.mxu1 %v852_v8 }
 0x17b   :  { %227 = vadd.xlane.f32.xlu1 %v226_v56 }
 0x1fb   :  { %v225_v60 = vpop.xlane.xlu0 %224 }
 0x1fc   :  { %v245_v57 = vpop.xlane.xlu1 %244  ;;  %v229_v63 = vsel %vm181_vm2, %v225_v60, 0.0 }
 0x1fd   :  { %v251_v59 = vrot.slane %v245_v57, 4  ;;  %v230_v3 = vrot.slane %v229_v63, 4 }
 0x1ff   :  { %v255_v61 = vsel %vm181_vm2, %v251_v59, 0.0  ;;  %v231_v7 = vadd.f32 %v230_v3, %v229_v63 }
 0x200   :  { %v248_v58 = vpop.xlane.xlu1 %247  ;;  %v256_v1 = vrot.slane %v255_v61, 4 }
 0x201   :  { %v252_v0 = vrot.slane %v248_v58, 4  ;;  %v232_v12 = vrot.slane %v231_v7, 2 }
 0x202   :  { %v257_v5 = vadd.f32 %v256_v1, %v255_v61 }
 0x203   :  { %v262_v4 = vsel %vm181_vm2, %v252_v0, 0.0  ;;  %v233_v16 = vadd.f32 %v232_v12, %v231_v7 }
 0x204   :  { %v228_v62 = vpop.xlane.xlu1 %227  ;;  %v263_v9 = vrot.slane %v262_v4, 4  ;;  %v258_v10 = vrot.slane %v257_v5, 2 }
 0x205   :  { %v236_v2 = vsel %vm181_vm2, %v228_v62, 0.0  ;;  %v234_v20 = vrot.slane %v233_v16, 1 }
 0x206   :  { %v237_v6 = vrot.slane %v236_v2, 4  ;;  %v264_v13 = vadd.f32 %v263_v9, %v262_v4  ;;  %v259_v14 = vadd.f32 %v258_v10, %v257_v5 }
 0x207   :  { %v235_v24 = vadd.f32 %v234_v20, %v233_v16 }
 0x208   :  { %v238_v11 = vadd.f32 %v237_v6, %v236_v2  ;;  %v265_v17 = vrot.slane %v264_v13, 2  ;;  %v260_v18 = vrot.slane %v259_v14, 1 }
 0x20a   :  { %v239_v15 = vrot.slane %v238_v11, 2  ;;  %v266_v21 = vadd.f32 %v265_v17, %v264_v13  ;;  %v261_v22 = vadd.f32 %v260_v18, %v259_v14 }
 0x20c   :  { %v240_v19 = vadd.f32 %v239_v15, %v238_v11  ;;  %v267_v25 = vrot.slane %v266_v21, 1  ;;  %v415_v26 = vmul.f32 %v261_v22, %v235_v24 }
 0x20e   :  { %v241_v23 = vrot.slane %v240_v19, 1  ;;  %v268_v28 = vadd.f32 %v267_v25, %v266_v21  ;;  %826 = vrcp.f32 %v415_v26 }
 0x210   :  { %v242_v27 = vadd.f32 %v241_v23, %v240_v19 }
 0x212   :  { %v416_v29 = vmul.f32 %v268_v28, %v242_v27 }
 0x214   :  { %828 = vrcp.f32 %v416_v29 }
 0x21b   :  { %v827_v30 = vpop.eup %826 }
 0x221   :  { %v829_v34 = vpop.eup %828 }
 0x234   :  { %v338_v31 = vpop.f32.mrf.mxu0 }
 0x235   :  { %v421_v32 = vmul.f32 %v827_v30, %v338_v31 }
 0x236   :  { %v787_v33 = vpop.f32.mrf.mxu0 }
 0x237   :  { %796 = vmatmul.mubr.msk.f32.vlgmr.msra.gmra.mxu0 %vm423_vm4, %v421_v32 }
 0x238   :  { %v411_v35 = vpop.f32.mrf.mxu1  ;;  %805 = vmatprep.mubr.msk.f32.mxu0 %vm853_vm1, %v852_v8 }
 0x239   :  { %v422_v36 = vmul.f32 %v829_v34, %v411_v35 }
 0x23a   :  { %v792_v37 = vpop.f32.mrf.mxu1 }
 0x23b   :  { %801 = vmatmul.mubr.msk.f32.vlgmr.msra.gmra.mxu1 %vm423_vm4, %v422_v36 }
 0x23c   :  { %810 = vmatprep.mubr.msk.f32.mxu1 %vm853_vm1, %v852_v8 }
 0x2f7   :  { %v496_v39 = vpop.f32.mrf.mxu0 }
 0x2f8   :  { %804 = vmatpush3.msk.msra.mxu0 %vm181_vm2, %v496_v39 }
 0x2f9   :  { %v797_v40 = vpop.f32.mrf.mxu0  ;;  %806 = vmatmul.mubr.msk.f32.vlgmr.msra.gmra.mxu0 %vm423_vm4, %v19_v38 }
 0x2fb   :  { %v572_v41 = vpop.f32.mrf.mxu1 }
 0x2fc   :  { %809 = vmatpush3.msk.msra.mxu1 %vm181_vm2, %v572_v41 }
 0x2fd   :  { %v802_v42 = vpop.f32.mrf.mxu1  ;;  %811 = vmatmul.mubr.msk.f32.vlgmr.msra.gmra.mxu1 %vm423_vm4, %v19_v38 }
 0x3b9   :  { %v648_v43 = vpop.f32.mrf.mxu0 }
 0x3ba   :  { %725 = vst [vmem:[#allocation2] sm:$0xff] %v648_v43 }
 0x3bb   :  { %v807_v8 = vpop.f32.mrf.mxu0 }
 0x3bd   :  { %v721_v44 = vpop.f32.mrf.mxu1 }
 0x3be   :  { %726 = vst [vmem:[#allocation2 + $0x8] sm:$0xff] %v721_v44 }
 0x3bf   :  { %v812_v45 = vpop.f32.mrf.mxu1 }
 0x3c0   :  { %841 = shalt.err (!%p838_p4)
}
 0x3c1   :  { %s855_s22 = smov 128   ;;  %s856_s23 = smov 8  }
 0x3c2   :  { %738 = dma.vmem_to_hbm [thread:$0]  %s733_s21, 256, %s942_s3, [#allocation3], %s855_s22, %s855_s22, %s856_s23  }
 0x3c3   :  { %850 = dma.done.wait [#allocation3], 256  }
 0x3c4   :  { %851 = vsyncadd [#allocation3], 4294967040 }
 0x3c5   :  { %742 = vsyncpa [#allocation3], 1 }

</bundles_post_ra>
